<compile_context>
chip_gen: v5e
topology: v5e:2x2
jax: 0.10.0
libtpu: 0.0.40
codegen_flags: <defaults>
</compile_context>

<pallas_src>
import numpy as np
import jax
import jax.numpy as jnp
from jax.experimental import pallas as pl
from jax.experimental.pallas import tpu as pltpu


def _round_up(v, k):
    return (v + k - 1) // k * k


def _cdiv(a, b):
    return -(-a // b)


def _spectral_kernel(x_ref, fr_ref, fi_ref, g_ref, wr_ref, wi_ref, o_ref):
    """One batch tile of SpectralF1d (batch-major, channel dims padded to multiples of 8).

    x_ref : (TB, Ci, N)   input tile, float32 (cast to compute dtype in-kernel)
    fr/fi : (N, m)        forward real-DFT cos / -sin matrices, compute dtype
    g_ref : (2m, N)       row-stacked inverse real-DFT matrix [Gr; Gi], compute dtype
    wr/wi : (Co, Ci, m)   complex mixing weights (output-major), float32
    o_ref : (TB, Co, N)   output tile, float32
    """
    tb, ci, n = x_ref.shape
    m = fr_ref.shape[1]
    co = wr_ref.shape[0]
    cdt = fr_ref.dtype

    # ---- Stage 1: forward DFT (first m rfft modes), MXU, f32 accumulation ----------
    # (TB, Ci, N) -> (TB*Ci, N) is a free leading-dim merge (Ci % 8 == 0, f32 tile).
    x2 = x_ref[...].reshape(tb * ci, n).astype(cdt)
    xr = jnp.dot(x2, fr_ref[...], preferred_element_type=jnp.float32)   # (TB*Ci, m)
    xi = jnp.dot(x2, fi_ref[...], preferred_element_type=jnp.float32)   # (TB*Ci, m)

    # ---- Stage 2: per-mode complex channel mix on the VPU (f32) --------------------
    # Y[b,o,k] = sum_i X[b,i,k] * W[i,o,k].  Broadcasts are along leading dims only and
    # the contraction is a sublane reduction; the last-two dims of every operand stay
    # dense (Ci, m) / (Co, m).
    xr4 = xr.reshape(tb, ci, m)[:, None, :, :]      # (TB, 1, Ci, m)
    xi4 = xi.reshape(tb, ci, m)[:, None, :, :]
    wr = wr_ref[...][None, :, :, :]                 # (1, Co, Ci, m)
    wi = wi_ref[...][None, :, :, :]
    yr = jnp.sum(xr4 * wr - xi4 * wi, axis=2)       # (TB, Co, m)
    yi = jnp.sum(xr4 * wi + xi4 * wr, axis=2)       # (TB, Co, m)

    # ---- Stage 3: inverse DFT of the truncated spectrum as ONE MXU matmul ----------
    # Lane-concat [yr | yi] against the row-stacked [Gr; Gi]: the K = 2m contraction
    # performs the real+imag add for free.
    yc = jnp.concatenate([yr, yi], axis=-1)                      # (TB, Co, 2m), f32
    yc2 = yc.reshape(tb * co, 2 * m).astype(cdt)                 # free merge (Co % 8 == 0)
    out = jnp.dot(yc2, g_ref[...], preferred_element_type=jnp.float32)   # (TB*Co, N)
    o_ref[...] = out.reshape(tb, co, n)


def make_spectral_f1d(in_channels, out_channels, modes1, n, *, compute_dtype=jnp.bfloat16):
    """One-time init: build the real-DFT matrices and return a jitted forward(x, wr, wi)."""
    ci, co = in_channels, out_channels
    m = int(modes1 / 2)                       # mirrors: self.modes1 = int(modes1 / 2)
    assert 1 <= m <= n // 2, "kept modes must fit in the half-spectrum (no Nyquist bin)"

    ci_p = _round_up(ci, 8)                   # pad channels so reshapes are layout-free
    co_p = _round_up(co, 8)

    # Trig / DFT-matrix construction hoisted into one-time init (f64 on host, cast once).
    t = np.arange(n, dtype=np.float64)
    k = np.arange(m, dtype=np.float64)
    ang_f = 2.0 * np.pi * np.outer(t, k) / n                    # (N, m)
    fr = jnp.asarray(np.cos(ang_f), compute_dtype)
    fi = jnp.asarray(-np.sin(ang_f), compute_dtype)
    ang_i = 2.0 * np.pi * np.outer(k, t) / n                    # (m, N)
    scl = np.where(k == 0, 1.0, 2.0)[:, None] / n               # DC counted once, others twice
    g_np = np.concatenate([scl * np.cos(ang_i), -scl * np.sin(ang_i)], axis=0)   # (2m, N)
    g = jnp.asarray(g_np, compute_dtype)

    cb = jnp.dtype(compute_dtype).itemsize

    @jax.jit
    def forward(x, w_real, w_imag):
        b = x.shape[0]
        assert x.shape == (b, ci, n)

        # ---- adaptive batch tile from an explicit VMEM budget ----------------------
        bytes_per_row = (
            2 * (ci_p * n * 4 + co_p * n * 4)        # double-buffered x / out tiles (f32)
            + ci_p * n * cb                          # x cast to compute dtype
            + 2 * ci_p * m * 4                       # xr, xi (f32)
            + 3 * ci_p * co_p * m * 4                # mix broadcast temporaries (peak, f32)
            + 4 * co_p * m * 4                       # yr, yi, yc (+ cast)
            + co_p * n * 4                           # inverse-DFT result before store
        )
        resident = 2 * (4 * n * m * cb + 2 * ci_p * co_p * m * 4)   # F, G, weights (x2 bufs)
        budget = 24 << 20
        avail = max(budget - resident, bytes_per_row)
        tb_max = max(1, min(512, avail // bytes_per_row))
        n_tiles = _cdiv(b, tb_max)
        tb = _cdiv(b, n_tiles)                       # minimizes batch padding
        b_pad = n_tiles * tb

        # ---- zero-pad batch / channels (only when actually needed) -----------------
        xp = x.astype(jnp.float32)
        if b_pad != b or ci_p != ci:
            xp = jnp.pad(xp, ((0, b_pad - b), (0, ci_p - ci), (0, 0)))
        wrp = w_real.astype(jnp.float32)
        wip = w_imag.astype(jnp.float32)
        if ci_p != ci or co_p != co:
            wrp = jnp.pad(wrp, ((0, ci_p - ci), (0, co_p - co), (0, 0)))
            wip = jnp.pad(wip, ((0, ci_p - ci), (0, co_p - co), (0, 0)))
        wrp = jnp.transpose(wrp, (1, 0, 2))          # (Co, Ci, m): leading-dim broadcasts only
        wip = jnp.transpose(wip, (1, 0, 2))

        flops = (4 * b_pad * ci_p * n * m            # forward-DFT dots
                 + 8 * b_pad * ci_p * co_p * m       # channel mix
                 + 4 * b_pad * co_p * m * n)         # fused inverse-DFT dot
        bytes_accessed = (b_pad * ci_p * n * 4 + b_pad * co_p * n * 4
                          + 4 * n * m * cb + 2 * ci_p * co_p * m * 4)
        cost = pl.CostEstimate(flops=int(flops), transcendentals=0,
                               bytes_accessed=int(bytes_accessed))

        need = resident + tb * bytes_per_row
        vmem_limit = int(min(max(2 * need, 32 << 20), 48 << 20))   # safe on v5e/v6e/v7x

        out = pl.pallas_call(
            _spectral_kernel,
            out_shape=jax.ShapeDtypeStruct((b_pad, co_p, n), jnp.float32),
            grid=(n_tiles,),
            in_specs=[
                pl.BlockSpec((tb, ci_p, n), lambda ib: (ib, 0, 0)),        # x tile (pipelined)
                pl.BlockSpec((n, m), lambda ib: (0, 0)),                   # Fr (resident)
                pl.BlockSpec((n, m), lambda ib: (0, 0)),                   # Fi (resident)
                pl.BlockSpec((2 * m, n), lambda ib: (0, 0)),               # [Gr; Gi] (resident)
                pl.BlockSpec((co_p, ci_p, m), lambda ib: (0, 0, 0)),       # W real (resident)
                pl.BlockSpec((co_p, ci_p, m), lambda ib: (0, 0, 0)),       # W imag (resident)
            ],
            out_specs=pl.BlockSpec((tb, co_p, n), lambda ib: (ib, 0, 0)),
            compiler_params=pltpu.CompilerParams(
                dimension_semantics=("parallel",),
                vmem_limit_bytes=vmem_limit,
            ),
            cost_estimate=cost,
        )(xp, fr, fi, g, wrp, wip)

        if b_pad != b or co_p != co:
            out = out[:b, :co]
        return out

    return forward


def reference_spectral_f1d(x, w_real, w_imag):
    """Pure-JAX reference mirroring the PyTorch forward (FFT-based)."""
    b, ci, n = x.shape
    co, m = w_real.shape[1], w_real.shape[2]
    w = w_real.astype(jnp.complex64) + 1j * w_imag.astype(jnp.complex64)
    x_ft = jnp.fft.rfft(x, axis=-1)
    mixed = jnp.einsum('bix,iox->box', x_ft[:, :, :m], w)
    out_ft = jnp.zeros((b, co, n // 2 + 1), dtype=jnp.complex64).at[:, :, :m].set(mixed)
    return jnp.fft.irfft(out_ft, n=n, axis=-1)


if __name__ == "__main__":
    # SpectralF1d(in_channels=4, out_channels=4, modes1=8) on (B=2, C=4, N=16) input.
    B, Ci, Co, N = 2, 4, 4, 16
    modes1 = 8
    m = int(modes1 / 2)
    scale = 1.0 / (Ci * Co)

    key = jax.random.PRNGKey(0)
    kx, kwr, kwi = jax.random.split(key, 3)
    x = jax.random.normal(kx, (B, Ci, N), dtype=jnp.float32)
    # torch.rand(..., dtype=cfloat) draws real & imag parts uniform in [0, 1)
    w_real = scale * jax.random.uniform(kwr, (Ci, Co, m), dtype=jnp.float32)
    w_imag = scale * jax.random.uniform(kwi, (Ci, Co, m), dtype=jnp.float32)

    ref = jax.block_until_ready(reference_spectral_f1d(x, w_real, w_imag))

    # Production path: bf16 operands on the MXU, f32 accumulation (tolerance reflects bf16).
    fwd_bf16 = make_spectral_f1d(Ci, Co, modes1, N, compute_dtype=jnp.bfloat16)
    out_bf16 = jax.block_until_ready(fwd_bf16(x, w_real, w_imag))
    np.testing.assert_allclose(np.asarray(out_bf16), np.asarray(ref), rtol=5e-2, atol=5e-2)

    # Full-precision path for a tight numerical check of the restructured math.
    fwd_f32 = make_spectral_f1d(Ci, Co, modes1, N, compute_dtype=jnp.float32)
    out_f32 = jax.block_until_ready(fwd_f32(x, w_real, w_imag))
    np.testing.assert_allclose(np.asarray(out_f32), np.asarray(ref), rtol=1e-4, atol=1e-4)

    print("KERNEL_OK")
</pallas_src>

<mosaic_0001>
module attributes {stable_mosaic.version = 11 : i64} {
  func.func @_spectral_kernel(%arg0: i32, %arg1: memref<2x8x16xf32, #tpu.memory_space<vmem>>, %arg2: memref<16x4xbf16, #tpu.memory_space<vmem>>, %arg3: memref<16x4xbf16, #tpu.memory_space<vmem>>, %arg4: memref<8x16xbf16, #tpu.memory_space<vmem>>, %arg5: memref<8x8x4xf32, #tpu.memory_space<vmem>>, %arg6: memref<8x8x4xf32, #tpu.memory_space<vmem>>, %arg7: memref<2x8x16xf32, #tpu.memory_space<vmem>>) attributes {dimension_semantics = [#tpu.dimension_semantics<parallel>], iteration_bounds = array<i64: 1>, scalar_prefetch = 0 : i64, scratch_operands = 0 : i64, tpu.core_type = #tpu.core_type<tc>, window_params = [{transform_indices = @transform_0, window_bounds = array<i64: 2, 8, 16>}, {pipeline_mode = #tpu.pipeline_mode<synchronous>, transform_indices = @transform_1, window_bounds = array<i64: 16, 4>}, {pipeline_mode = #tpu.pipeline_mode<synchronous>, transform_indices = @transform_2, window_bounds = array<i64: 16, 4>}, {pipeline_mode = #tpu.pipeline_mode<synchronous>, transform_indices = @transform_3, window_bounds = array<i64: 8, 16>}, {pipeline_mode = #tpu.pipeline_mode<synchronous>, transform_indices = @transform_4, window_bounds = array<i64: 8, 8, 4>}, {pipeline_mode = #tpu.pipeline_mode<synchronous>, transform_indices = @transform_5, window_bounds = array<i64: 8, 8, 4>}, {transform_indices = @transform_6, window_bounds = array<i64: 2, 8, 16>}]} {
    %c0 = arith.constant 0 : index
    %c0_0 = arith.constant 0 : index
    %c0_1 = arith.constant 0 : index
    %0 = vector.load %arg1[%c0, %c0_0, %c0_1] : memref<2x8x16xf32, #tpu.memory_space<vmem>>, vector<2x8x16xf32>
    %1 = vector.shape_cast %0 : vector<2x8x16xf32> to vector<16x16xf32>
    %2 = arith.truncf %1 : vector<16x16xf32> to vector<16x16xbf16>
    %c0_2 = arith.constant 0 : index
    %c0_3 = arith.constant 0 : index
    %3 = vector.load %arg2[%c0_2, %c0_3] : memref<16x4xbf16, #tpu.memory_space<vmem>>, vector<16x4xbf16>
    %cst = arith.constant dense<0.000000e+00> : vector<16x4xf32>
    %4 = tpu.matmul %2, %3, %cst {dimension_numbers = #tpu.dot_dimension_numbers<[1], [0], [0], [1], [0, 0, 1, 1], [], []>} : vector<16x16xbf16>, vector<16x4xbf16>, vector<16x4xf32> -> vector<16x4xf32>
    %c0_4 = arith.constant 0 : index
    %c0_5 = arith.constant 0 : index
    %5 = vector.load %arg3[%c0_4, %c0_5] : memref<16x4xbf16, #tpu.memory_space<vmem>>, vector<16x4xbf16>
    %cst_6 = arith.constant dense<0.000000e+00> : vector<16x4xf32>
    %6 = tpu.matmul %2, %5, %cst_6 {dimension_numbers = #tpu.dot_dimension_numbers<[1], [0], [0], [1], [0, 0, 1, 1], [], []>} : vector<16x16xbf16>, vector<16x4xbf16>, vector<16x4xf32> -> vector<16x4xf32>
    %7 = vector.shape_cast %4 : vector<16x4xf32> to vector<2x8x4xf32>
    %8 = vector.shape_cast %7 : vector<2x8x4xf32> to vector<2x1x8x4xf32>
    %9 = vector.shape_cast %6 : vector<16x4xf32> to vector<2x8x4xf32>
    %10 = vector.shape_cast %9 : vector<2x8x4xf32> to vector<2x1x8x4xf32>
    %c0_7 = arith.constant 0 : index
    %c0_8 = arith.constant 0 : index
    %c0_9 = arith.constant 0 : index
    %11 = vector.load %arg5[%c0_7, %c0_8, %c0_9] : memref<8x8x4xf32, #tpu.memory_space<vmem>>, vector<8x8x4xf32>
    %12 = vector.shape_cast %11 : vector<8x8x4xf32> to vector<1x8x8x4xf32>
    %c0_10 = arith.constant 0 : index
    %c0_11 = arith.constant 0 : index
    %c0_12 = arith.constant 0 : index
    %13 = vector.load %arg6[%c0_10, %c0_11, %c0_12] : memref<8x8x4xf32, #tpu.memory_space<vmem>>, vector<8x8x4xf32>
    %14 = vector.shape_cast %13 : vector<8x8x4xf32> to vector<1x8x8x4xf32>
    %15 = vector.broadcast %8 : vector<2x1x8x4xf32> to vector<2x8x8x4xf32>
    %16 = vector.broadcast %12 : vector<1x8x8x4xf32> to vector<2x8x8x4xf32>
    %17 = arith.mulf %15, %16 : vector<2x8x8x4xf32>
    %18 = vector.broadcast %10 : vector<2x1x8x4xf32> to vector<2x8x8x4xf32>
    %19 = vector.broadcast %14 : vector<1x8x8x4xf32> to vector<2x8x8x4xf32>
    %20 = arith.mulf %18, %19 : vector<2x8x8x4xf32>
    %21 = arith.subf %17, %20 : vector<2x8x8x4xf32>
    %cst_13 = arith.constant dense<0.000000e+00> : vector<2x8x4xf32>
    %22 = vector.multi_reduction <add>, %21, %cst_13 [2] : vector<2x8x8x4xf32> to vector<2x8x4xf32>
    %23 = vector.broadcast %8 : vector<2x1x8x4xf32> to vector<2x8x8x4xf32>
    %24 = vector.broadcast %14 : vector<1x8x8x4xf32> to vector<2x8x8x4xf32>
    %25 = arith.mulf %23, %24 : vector<2x8x8x4xf32>
    %26 = vector.broadcast %10 : vector<2x1x8x4xf32> to vector<2x8x8x4xf32>
    %27 = vector.broadcast %12 : vector<1x8x8x4xf32> to vector<2x8x8x4xf32>
    %28 = arith.mulf %26, %27 : vector<2x8x8x4xf32>
    %29 = arith.addf %25, %28 : vector<2x8x8x4xf32>
    %cst_14 = arith.constant dense<0.000000e+00> : vector<2x8x4xf32>
    %30 = vector.multi_reduction <add>, %29, %cst_14 [2] : vector<2x8x8x4xf32> to vector<2x8x4xf32>
    %31 = tpu.concatenate %22, %30 in 2 : vector<2x8x4xf32>, vector<2x8x4xf32> -> vector<2x8x8xf32>
    %32 = vector.shape_cast %31 : vector<2x8x8xf32> to vector<16x8xf32>
    %33 = arith.truncf %32 : vector<16x8xf32> to vector<16x8xbf16>
    %c0_15 = arith.constant 0 : index
    %c0_16 = arith.constant 0 : index
    %34 = vector.load %arg4[%c0_15, %c0_16] : memref<8x16xbf16, #tpu.memory_space<vmem>>, vector<8x16xbf16>
    %cst_17 = arith.constant dense<0.000000e+00> : vector<16x16xf32>
    %35 = tpu.matmul %33, %34, %cst_17 {dimension_numbers = #tpu.dot_dimension_numbers<[1], [0], [0], [1], [0, 0, 1, 1], [], []>} : vector<16x8xbf16>, vector<8x16xbf16>, vector<16x16xf32> -> vector<16x16xf32>
    %36 = vector.shape_cast %35 : vector<16x16xf32> to vector<2x8x16xf32>
    %c0_18 = arith.constant 0 : index
    %c0_19 = arith.constant 0 : index
    %c0_20 = arith.constant 0 : index
    %37 = vector.load %arg7[%c0_18, %c0_19, %c0_20] : memref<2x8x16xf32, #tpu.memory_space<vmem>>, vector<2x8x16xf32>
    tpu.vector_store %arg7[%c0_18, %c0_19, %c0_20], %36 {strides = array<i32>} : memref<2x8x16xf32, #tpu.memory_space<vmem>>, vector<2x8x16xf32>,
    return
  }
  func.func @transform_0(%arg0: i32) -> (i32, i32, i32) {
    %c0_i32 = arith.constant 0 : i32
    %c0_i32_0 = arith.constant 0 : i32
    %c0_i32_1 = arith.constant 0 : i32
    return %arg0, %c0_i32, %c0_i32_0 : i32, i32, i32
  }
  func.func @transform_1(%arg0: i32) -> (i32, i32) {
    %c0_i32 = arith.constant 0 : i32
    %c0_i32_0 = arith.constant 0 : i32
    %c0_i32_1 = arith.constant 0 : i32
    return %c0_i32, %c0_i32_0 : i32, i32
  }
  func.func @transform_2(%arg0: i32) -> (i32, i32) {
    %c0_i32 = arith.constant 0 : i32
    %c0_i32_0 = arith.constant 0 : i32
    %c0_i32_1 = arith.constant 0 : i32
    return %c0_i32, %c0_i32_0 : i32, i32
  }
  func.func @transform_3(%arg0: i32) -> (i32, i32) {
    %c0_i32 = arith.constant 0 : i32
    %c0_i32_0 = arith.constant 0 : i32
    %c0_i32_1 = arith.constant 0 : i32
    return %c0_i32, %c0_i32_0 : i32, i32
  }
  func.func @transform_4(%arg0: i32) -> (i32, i32, i32) {
    %c0_i32 = arith.constant 0 : i32
    %c0_i32_0 = arith.constant 0 : i32
    %c0_i32_1 = arith.constant 0 : i32
    %c0_i32_2 = arith.constant 0 : i32
    return %c0_i32, %c0_i32_0, %c0_i32_1 : i32, i32, i32
  }
  func.func @transform_5(%arg0: i32) -> (i32, i32, i32) {
    %c0_i32 = arith.constant 0 : i32
    %c0_i32_0 = arith.constant 0 : i32
    %c0_i32_1 = arith.constant 0 : i32
    %c0_i32_2 = arith.constant 0 : i32
    return %c0_i32, %c0_i32_0, %c0_i32_1 : i32, i32, i32
  }
  func.func @transform_6(%arg0: i32) -> (i32, i32, i32) {
    %c0_i32 = arith.constant 0 : i32
    %c0_i32_0 = arith.constant 0 : i32
    %c0_i32_1 = arith.constant 0 : i32
    return %arg0, %c0_i32, %c0_i32_0 : i32, i32, i32
  }
}

</mosaic_0001>

<bundles_post_ra>
// kernel: forward.1
= control target key start
LH: loop header
LB: loop body
LE: loop exit
PB: predicated region body
PF: predicated region fallthrough
CT: control target
= control target key end

     0   :  { %vm35_vm0 = vcmask 130048   ;;  %vm139_vm1 = vcmask 31744   ;;  %vm428_vm2 = vcmask 1041409   ;;  %vm430_vm3 = vcmask 1042434   ;;  %s1007_s1 = inlined_call_operand.vmem [shape: bf16[16,4], index: 1, kind: input, shape index: {}]   ;;  %s1008_s2 = inlined_call_operand.vmem [shape: bf16[16,4], index: 2, kind: input, shape index: {}]   ;;  %s1009_s0 = inlined_call_operand.vmem [shape: f32[2,8,16], index: 0, kind: input, shape index: {}]   ;;  %s1010_s5 = inlined_call_operand.vmem [shape: f32[8,8,4], index: 5, kind: input, shape index: {}]   ;;  %s1011_s4 = inlined_call_operand.vmem [shape: f32[8,8,4], index: 4, kind: input, shape index: {}]   ;;  %s1012_s3 = inlined_call_operand.vmem [shape: bf16[8,16], index: 3, kind: input, shape index: {}]   ;;  %s1013_s6 = inlined_call_operand.vmem [shape: f32[2,8,16], index: 6, kind: output, shape index: {}]  }
   0x1   :  { %v530_v0 = vld [vmem:[%s1007_s1] sm:$0xff]  ;;  %v25_v3 = vld [vmem:[%s1009_s0 + $0x8] sm:$0xff]  ;;  %v611_v9 = vld [vmem:[%s1010_s5 + $0x10] sm:$0xff]  ;;  %vm432_vm4 = vcmask 1043459   ;;  %vm434_vm5 = vcmask 1044484   ;;  %vm436_vm6 = vcmask 1045509  }
   0x2   :  { %v531_v1 = vld [vmem:[%s1008_s2] sm:$0xff]  ;;  %46 = vmatpush.bf16.msra.mxu0 %v530_v0  ;;  %v596_v6 = vld [vmem:[%s1010_s5 + $0x8] sm:$0xff]  ;;  %v616_v10 = vld [vmem:[%s1010_s5 + $0x18] sm:$0xff]  ;;  %vm438_vm7 = vcmask 1046534   ;;  %vm440_vm8 = vcmask 1047559   ;;  %vm495_vm9 = vcmask 1043456  }
   0x3   :  { %v24_v2 = vld [vmem:[%s1009_s0] sm:$0xff]  ;;  %68 = vmatpush.bf16.msra.mxu1 %v531_v1  ;;  %v606_v8 = vld [vmem:[%s1011_s4 + $0x8] sm:$0xff]  ;;  %v631_v13 = vld [vmem:[%s1010_s5 + $0x30] sm:$0xff]  ;;  %vm491_vm10 = vcmask 64512  }
   0x4   :  { %v26_v4 = vpack.c.bf16 %v25_v3, %v24_v2  ;;  %v591_v5 = vld [vmem:[%s1010_s5] sm:$0xff]  ;;  %v626_v12 = vld [vmem:[%s1010_s5 + $0x28] sm:$0xff]  ;;  %v636_v14 = vld [vmem:[%s1010_s5 + $0x38] sm:$0xff] }
   0x5   :  { %v601_v7 = vld [vmem:[%s1011_s4] sm:$0xff]  ;;  %v645_v17 = vld [vmem:[%s1011_s4 + $0x10] sm:$0xff]  ;;  %v650_v18 = vld [vmem:[%s1011_s4 + $0x18] sm:$0xff] }
   0x6   :  { %523 = vmatmul.msk.bf16.vlgmr.msra.gmra.mxu0 %vm35_vm0, %v26_v4  ;;  %528 = vmatmul.msk.bf16.vlgmr.msra.gmra.mxu1 %vm35_vm0, %v26_v4  ;;  %v621_v11 = vld [vmem:[%s1010_s5 + $0x20] sm:$0xff]  ;;  %v660_v20 = vld [vmem:[%s1011_s4 + $0x28] sm:$0xff]  ;;  %v665_v21 = vld [vmem:[%s1011_s4 + $0x30] sm:$0xff] }
   0x7   :  { %v655_v19 = vld [vmem:[%s1011_s4 + $0x20] sm:$0xff]  ;;  %v670_v22 = vld [vmem:[%s1011_s4 + $0x38] sm:$0xff]  ;;  %s538_s4 = smov 4  }
  0x83   :  { %v638_v15 = vpop.f32.mrf.mxu0  ;;  %v640_v16 = vpop.f32.mrf.mxu1 }
  0x84   :  { %v252_v23 = vmul.f32 %v591_v5, %v638_v15  ;;  %v253_v24 = vmul.f32 %v596_v6, %v638_v15  ;;  %v254_v25 = vmul.f32 %v611_v9, %v638_v15  ;;  %v255_v26 = vmul.f32 %v616_v10, %v638_v15 }
  0x85   :  { %v256_v27 = vmul.f32 %v621_v11, %v638_v15  ;;  %v257_v28 = vmul.f32 %v626_v12, %v638_v15  ;;  %v258_v29 = vmul.f32 %v631_v13, %v638_v15  ;;  %v259_v30 = vmul.f32 %v636_v14, %v638_v15 }
  0x86   :  { %v268_v31 = vmul.f32 %v601_v7, %v640_v16  ;;  %v269_v32 = vmul.f32 %v606_v8, %v640_v16  ;;  %v270_v33 = vmul.f32 %v645_v17, %v640_v16  ;;  %v271_v34 = vmul.f32 %v650_v18, %v640_v16 }
  0x87   :  { %v272_v35 = vmul.f32 %v655_v19, %v640_v16  ;;  %v273_v36 = vmul.f32 %v660_v20, %v640_v16  ;;  %v274_v37 = vmul.f32 %v665_v21, %v640_v16  ;;  %v275_v38 = vmul.f32 %v670_v22, %v640_v16 }
  0x88   :  { %v284_v39 = vadd.f32 %v268_v31, %v252_v23  ;;  %v285_v40 = vadd.f32 %v269_v32, %v253_v24  ;;  %v286_v41 = vadd.f32 %v270_v33, %v254_v25  ;;  %v287_v42 = vadd.f32 %v271_v34, %v255_v26 }
  0x89   :  { %v288_v43 = vadd.f32 %v272_v35, %v256_v27  ;;  %v289_v44 = vadd.f32 %v273_v36, %v257_v28  ;;  %v290_v45 = vadd.f32 %v274_v37, %v258_v29  ;;  %v291_v46 = vadd.f32 %v275_v38, %v259_v30 }
  0x8a   :  { %v300_v47 = vsel %vm139_vm1, %v284_v39, 0.0  ;;  %v307_v48 = vsel %vm139_vm1, %v285_v40, 0.0  ;;  %v314_v49 = vsel %vm139_vm1, %v286_v41, 0.0  ;;  %v321_v50 = vsel %vm139_vm1, %v287_v42, 0.0 }
  0x8b   :  { %v708_v51 = vpop.f32.mrf.mxu0  ;;  %v710_v52 = vpop.f32.mrf.mxu1  ;;  %v301_v53 = vrot.slane %v300_v47, 4  ;;  %v308_v54 = vrot.slane %v307_v48, 4  ;;  %v315_v55 = vrot.slane %v314_v49, 4  ;;  %v322_v56 = vrot.slane %v321_v50, 4 }
  0x8c   :  { %v260_v57 = vmul.f32 %v591_v5, %v708_v51  ;;  %v261_v58 = vmul.f32 %v596_v6, %v708_v51  ;;  %v262_v59 = vmul.f32 %v611_v9, %v708_v51  ;;  %v263_v60 = vmul.f32 %v616_v10, %v708_v51 }
  0x8d   :  { %v264_v61 = vmul.f32 %v621_v11, %v708_v51  ;;  %v265_v62 = vmul.f32 %v626_v12, %v708_v51  ;;  %v266_v63 = vmul.f32 %v631_v13, %v708_v51  ;;  %v267_v0 = vmul.f32 %v636_v14, %v708_v51 }
  0x8e   :  { %v276_v1 = vmul.f32 %v601_v7, %v710_v52  ;;  %v277_v2 = vmul.f32 %v606_v8, %v710_v52  ;;  %v278_v3 = vmul.f32 %v645_v17, %v710_v52  ;;  %v279_v4 = vmul.f32 %v650_v18, %v710_v52 }
  0x8f   :  { %v280_v23 = vmul.f32 %v655_v19, %v710_v52  ;;  %v281_v24 = vmul.f32 %v660_v20, %v710_v52  ;;  %v282_v25 = vmul.f32 %v665_v21, %v710_v52  ;;  %v283_v26 = vmul.f32 %v670_v22, %v710_v52 }
  0x90   :  { %v292_v27 = vadd.f32 %v276_v1, %v260_v57  ;;  %v293_v28 = vadd.f32 %v277_v2, %v261_v58  ;;  %v294_v29 = vadd.f32 %v278_v3, %v262_v59  ;;  %v295_v30 = vadd.f32 %v279_v4, %v263_v60 }
  0x91   :  { %v744_v31 = vadd.f32 %v280_v23, %v264_v61  ;;  %v746_v32 = vadd.f32 %v281_v24, %v265_v62  ;;  %v748_v33 = vadd.f32 %v282_v25, %v266_v63  ;;  %v750_v34 = vadd.f32 %v283_v26, %v267_v0 }
  0x92   :  { %v302_v35 = vadd.f32 %v301_v53, %v300_v47  ;;  %v309_v36 = vadd.f32 %v308_v54, %v307_v48  ;;  %v316_v37 = vadd.f32 %v315_v55, %v314_v49  ;;  %v323_v38 = vadd.f32 %v322_v56, %v321_v50 }
  0x93   :  { %v328_v39 = vsel %vm139_vm1, %v288_v43, 0.0  ;;  %v335_v40 = vsel %vm139_vm1, %v289_v44, 0.0  ;;  %v342_v41 = vsel %vm139_vm1, %v290_v45, 0.0  ;;  %v349_v42 = vsel %vm139_vm1, %v291_v46, 0.0 }
  0x94   :  { %v303_v57 = vrot.slane %v302_v35, 2  ;;  %v310_v58 = vrot.slane %v309_v36, 2  ;;  %v317_v59 = vrot.slane %v316_v37, 2  ;;  %v324_v60 = vrot.slane %v323_v38, 2 }
  0x95   :  { %v329_v61 = vrot.slane %v328_v39, 4  ;;  %v336_v62 = vrot.slane %v335_v40, 4  ;;  %v343_v63 = vrot.slane %v342_v41, 4  ;;  %v350_v0 = vrot.slane %v349_v42, 4 }
  0x96   :  { %v304_v47 = vadd.f32 %v303_v57, %v302_v35  ;;  %v311_v48 = vadd.f32 %v310_v58, %v309_v36  ;;  %v318_v49 = vadd.f32 %v317_v59, %v316_v37  ;;  %v325_v50 = vadd.f32 %v324_v60, %v323_v38 }
  0x97   :  { %v330_v53 = vadd.f32 %v329_v61, %v328_v39  ;;  %v337_v43 = vadd.f32 %v336_v62, %v335_v40  ;;  %v344_v54 = vadd.f32 %v343_v63, %v342_v41  ;;  %v351_v44 = vadd.f32 %v350_v0, %v349_v42 }
  0x98   :  { %v305_v55 = vrot.slane %v304_v47, 1  ;;  %v312_v45 = vrot.slane %v311_v48, 1  ;;  %v319_v56 = vrot.slane %v318_v49, 1  ;;  %v326_v46 = vrot.slane %v325_v50, 1 }
  0x99   :  { %v331_v1 = vrot.slane %v330_v53, 2  ;;  %v338_v2 = vrot.slane %v337_v43, 2  ;;  %v345_v3 = vrot.slane %v344_v54, 2  ;;  %v352_v4 = vrot.slane %v351_v44, 2 }
  0x9a   :  { %v756_v23 = vadd.f32 %v305_v55, %v304_v47  ;;  %v758_v24 = vadd.f32 %v312_v45, %v311_v48  ;;  %v760_v25 = vadd.f32 %v319_v56, %v318_v49  ;;  %v762_v26 = vadd.f32 %v326_v46, %v325_v50 }
  0x9b   :  { %v332_v35 = vadd.f32 %v331_v1, %v330_v53  ;;  %v339_v36 = vadd.f32 %v338_v2, %v337_v43  ;;  %v346_v37 = vadd.f32 %v345_v3, %v344_v54  ;;  %v353_v38 = vadd.f32 %v352_v4, %v351_v44 }
  0x9c   :  { %v356_v39 = vsel %vm139_vm1, %v292_v27, 0.0  ;;  %v363_v40 = vsel %vm139_vm1, %v293_v28, 0.0  ;;  %v370_v41 = vsel %vm139_vm1, %v294_v29, 0.0  ;;  %v377_v42 = vsel %vm139_vm1, %v295_v30, 0.0 }
  0x9d   :  { %v333_v57 = vrot.slane %v332_v35, 1  ;;  %v340_v58 = vrot.slane %v339_v36, 1  ;;  %v347_v59 = vrot.slane %v346_v37, 1  ;;  %v354_v60 = vrot.slane %v353_v38, 1 }
  0x9e   :  { %v357_v61 = vrot.slane %v356_v39, 4  ;;  %v364_v62 = vrot.slane %v363_v40, 4  ;;  %v371_v63 = vrot.slane %v370_v41, 4  ;;  %v378_v0 = vrot.slane %v377_v42, 4 }
  0x9f   :  { %v768_v47 = vadd.f32 %v333_v57, %v332_v35  ;;  %v770_v48 = vadd.f32 %v340_v58, %v339_v36  ;;  %v772_v49 = vadd.f32 %v347_v59, %v346_v37  ;;  %v774_v27 = vadd.f32 %v354_v60, %v353_v38 }
  0xa0   :  { %v358_v28 = vadd.f32 %v357_v61, %v356_v39  ;;  %v365_v29 = vadd.f32 %v364_v62, %v363_v40  ;;  %v372_v50 = vadd.f32 %v371_v63, %v370_v41  ;;  %v379_v30 = vadd.f32 %v378_v0, %v377_v42 }
  0xa1   :  { %v384_v53 = vsel %vm139_vm1, %v744_v31, 0.0  ;;  %v391_v43 = vsel %vm139_vm1, %v746_v32, 0.0  ;;  %v398_v54 = vsel %vm139_vm1, %v748_v33, 0.0  ;;  %v405_v44 = vsel %vm139_vm1, %v750_v34, 0.0 }
  0xa2   :  { %v359_v55 = vrot.slane %v358_v28, 2  ;;  %v366_v45 = vrot.slane %v365_v29, 2  ;;  %v373_v56 = vrot.slane %v372_v50, 2  ;;  %v380_v46 = vrot.slane %v379_v30, 2 }
  0xa3   :  { %v385_v1 = vrot.slane %v384_v53, 4  ;;  %v392_v2 = vrot.slane %v391_v43, 4  ;;  %v399_v3 = vrot.slane %v398_v54, 4  ;;  %v406_v4 = vrot.slane %v405_v44, 4 }
  0xa4   :  { %v360_v35 = vadd.f32 %v359_v55, %v358_v28  ;;  %v367_v36 = vadd.f32 %v366_v45, %v365_v29  ;;  %v374_v31 = vadd.f32 %v373_v56, %v372_v50  ;;  %v381_v37 = vadd.f32 %v380_v46, %v379_v30 }
  0xa5   :  { %v386_v38 = vadd.f32 %v385_v1, %v384_v53  ;;  %v393_v32 = vadd.f32 %v392_v2, %v391_v43  ;;  %v400_v39 = vadd.f32 %v399_v3, %v398_v54  ;;  %v407_v40 = vadd.f32 %v406_v4, %v405_v44 }
  0xa6   :  { %v361_v33 = vrot.slane %v360_v35, 1  ;;  %v368_v41 = vrot.slane %v367_v36, 1  ;;  %v375_v42 = vrot.slane %v374_v31, 1  ;;  %v382_v34 = vrot.slane %v381_v37, 1 }
  0xa7   :  { %v387_v57 = vrot.slane %v386_v38, 2  ;;  %v394_v58 = vrot.slane %v393_v32, 2  ;;  %v401_v59 = vrot.slane %v400_v39, 2  ;;  %v408_v60 = vrot.slane %v407_v40, 2 }
  0xa8   :  { %v362_v61 = vadd.f32 %v361_v33, %v360_v35  ;;  %v369_v62 = vadd.f32 %v368_v41, %v367_v36  ;;  %v376_v63 = vadd.f32 %v375_v42, %v374_v31  ;;  %v383_v0 = vadd.f32 %v382_v34, %v381_v37 }
  0xa9   :  { %v388_v28 = vadd.f32 %v387_v57, %v386_v38  ;;  %v395_v29 = vadd.f32 %v394_v58, %v393_v32  ;;  %v402_v50 = vadd.f32 %v401_v59, %v400_v39  ;;  %v409_v30 = vadd.f32 %v408_v60, %v407_v40 }
  0xaa   :  { %v467_v55 = vsel %vm428_vm2, %v758_v24, %v756_v23  ;;  %v474_v3 = vsel %vm428_vm2, %v369_v62, %v362_v61  ;;  %v792_v4 = vmul.f32 %v601_v7, %v638_v15  ;;  %v796_v35 = vmul.f32 %v606_v8, %v638_v15 }
  0xab   :  { %v389_v53 = vrot.slane %v388_v28, 1  ;;  %v396_v43 = vrot.slane %v395_v29, 1  ;;  %v403_v54 = vrot.slane %v402_v50, 1  ;;  %v410_v44 = vrot.slane %v409_v30, 1 }
  0xac   :  { %v468_v2 = vsel %vm430_vm3, %v760_v25, %v467_v55  ;;  %v475_v24 = vsel %vm430_vm3, %v376_v63, %v474_v3  ;;  %v803_v36 = vmul.f32 %v645_v17, %v638_v15  ;;  %v807_v25 = vmul.f32 %v650_v18, %v638_v15 }
  0xad   :  { %v390_v45 = vadd.f32 %v389_v53, %v388_v28  ;;  %v397_v56 = vadd.f32 %v396_v43, %v395_v29  ;;  %v404_v46 = vadd.f32 %v403_v54, %v402_v50  ;;  %v411_v1 = vadd.f32 %v410_v44, %v409_v30 }
  0xae   :  { %v469_v23 = vsel %vm432_vm4, %v762_v26, %v468_v2  ;;  %v476_v37 = vsel %vm432_vm4, %v383_v0, %v475_v24  ;;  %v814_v38 = vmul.f32 %v655_v19, %v638_v15  ;;  %v818_v26 = vmul.f32 %v660_v20, %v638_v15 }
  0xaf   :  { %v470_v31 = vsel %vm434_vm5, %v768_v47, %v469_v23  ;;  %v477_v39 = vsel %vm434_vm5, %v390_v45, %v476_v37  ;;  %v825_v40 = vmul.f32 %v665_v21, %v638_v15  ;;  %v829_v47 = vmul.f32 %v670_v22, %v638_v15 }
  0xb0   :  { %v471_v32 = vsel %vm436_vm6, %v770_v48, %v470_v31  ;;  %v478_v41 = vsel %vm436_vm6, %v397_v56, %v477_v39  ;;  %v836_v42 = vmul.f32 %v601_v7, %v708_v51  ;;  %v840_v48 = vmul.f32 %v606_v8, %v708_v51 }
  0xb1   :  { %v472_v33 = vsel %vm438_vm7, %v772_v49, %v471_v32  ;;  %v479_v57 = vsel %vm438_vm7, %v404_v46, %v478_v41  ;;  %v847_v15 = vmul.f32 %v645_v17, %v708_v51  ;;  %v851_v49 = vmul.f32 %v650_v18, %v708_v51 }
  0xb2   :  { %v473_v34 = vsel %vm440_vm8, %v774_v27, %v472_v33  ;;  %v480_v7 = vsel %vm440_vm8, %v411_v1, %v479_v57  ;;  %v856_v58 = vmul.f32 %v655_v19, %v708_v51  ;;  %v860_v8 = vmul.f32 %v660_v20, %v708_v51 }
  0xb3   :  { %v864_v27 = vmul.f32 %v665_v21, %v708_v51  ;;  %v533_v17 = vpack.i.bf16 %v480_v7, %v473_v34  ;;  %v868_v59 = vmul.f32 %v670_v22, %v708_v51  ;;  %v107_v18 = vmul.f32 %v591_v5, %v640_v16 }
  0xb4   :  { %v108_v19 = vmul.f32 %v596_v6, %v640_v16  ;;  %v109_v60 = vmul.f32 %v611_v9, %v640_v16  ;;  %v110_v20 = vmul.f32 %v616_v10, %v640_v16  ;;  %v111_v21 = vmul.f32 %v621_v11, %v640_v16 }
  0xb5   :  { %v112_v61 = vmul.f32 %v626_v12, %v640_v16  ;;  %534 = vrot.lane.b32.xlu0 %v533_v17, %s538_s4  ;;  %v113_v22 = vmul.f32 %v631_v13, %v640_v16  ;;  %v114_v51 = vmul.f32 %v636_v14, %v640_v16  ;;  %v888_v62 = vmul.f32 %v591_v5, %v710_v52 }
  0xb6   :  { %v892_v63 = vmul.f32 %v596_v6, %v710_v52  ;;  %v896_v0 = vmul.f32 %v611_v9, %v710_v52  ;;  %v900_v28 = vmul.f32 %v616_v10, %v710_v52  ;;  %v904_v29 = vmul.f32 %v621_v11, %v710_v52 }
  0xb7   :  { %v908_v5 = vmul.f32 %v626_v12, %v710_v52  ;;  %v912_v6 = vmul.f32 %v631_v13, %v710_v52  ;;  %v916_v9 = vmul.f32 %v636_v14, %v710_v52  ;;  %v123_v16 = vsub.f32 %v792_v4, %v107_v18 }
  0xb8   :  { %v124_v10 = vsub.f32 %v796_v35, %v108_v19  ;;  %v125_v50 = vsub.f32 %v803_v36, %v109_v60  ;;  %v126_v11 = vsub.f32 %v807_v25, %v110_v20  ;;  %v127_v30 = vsub.f32 %v814_v38, %v111_v21 }
  0xb9   :  { %v128_v12 = vsub.f32 %v818_v26, %v112_v61  ;;  %v129_v53 = vsub.f32 %v825_v40, %v113_v22  ;;  %v130_v13 = vsub.f32 %v829_v47, %v114_v51  ;;  %v131_v14 = vsub.f32 %v836_v42, %v888_v62 }
  0xba   :  { %v132_v52 = vsub.f32 %v840_v48, %v892_v63  ;;  %v133_v43 = vsub.f32 %v847_v15, %v896_v0  ;;  %v134_v54 = vsub.f32 %v851_v49, %v900_v28  ;;  %v135_v44 = vsub.f32 %v856_v58, %v904_v29 }
  0xbb   :  { %v136_v55 = vsub.f32 %v860_v8, %v908_v5  ;;  %v137_v45 = vsub.f32 %v864_v27, %v912_v6  ;;  %v138_v56 = vsub.f32 %v868_v59, %v916_v9  ;;  %v140_v46 = vsel %vm139_vm1, %v123_v16, 0.0 }
  0xbc   :  { %v147_v1 = vsel %vm139_vm1, %v124_v10, 0.0  ;;  %v141_v2 = vrot.slane %v140_v46, 4  ;;  %v154_v4 = vsel %vm139_vm1, %v125_v50, 0.0  ;;  %v161_v35 = vsel %vm139_vm1, %v126_v11, 0.0 }
  0xbd   :  { %v148_v3 = vrot.slane %v147_v1, 4  ;;  %v155_v23 = vrot.slane %v154_v4, 4  ;;  %v162_v24 = vrot.slane %v161_v35, 4  ;;  %v168_v36 = vsel %vm139_vm1, %v127_v30, 0.0 }
  0xbe   :  { %v175_v25 = vsel %vm139_vm1, %v128_v12, 0.0  ;;  %v142_v31 = vadd.f32 %v141_v2, %v140_v46  ;;  %v169_v38 = vrot.slane %v168_v36, 4  ;;  %v182_v40 = vsel %vm139_vm1, %v129_v53, 0.0 }
  0xbf   :  { %v149_v37 = vadd.f32 %v148_v3, %v147_v1  ;;  %v176_v26 = vrot.slane %v175_v25, 4  ;;  %v156_v32 = vadd.f32 %v155_v23, %v154_v4  ;;  %v163_v39 = vadd.f32 %v162_v24, %v161_v35 }
  0xc0   :  { %v189_v47 = vsel %vm139_vm1, %v130_v13, 0.0  ;;  %v143_v33 = vrot.slane %v142_v31, 2  ;;  %v170_v42 = vadd.f32 %v169_v38, %v168_v36  ;;  %v183_v15 = vrot.slane %v182_v40, 4 }
  0xc1   :  { %v150_v41 = vrot.slane %v149_v37, 2  ;;  %v177_v48 = vadd.f32 %v176_v26, %v175_v25  ;;  %v157_v34 = vrot.slane %v156_v32, 2  ;;  %v164_v57 = vrot.slane %v163_v39, 2 }
  0xc2   :  { %v190_v49 = vrot.slane %v189_v47, 4  ;;  %v144_v7 = vadd.f32 %v143_v33, %v142_v31  ;;  %v171_v8 = vrot.slane %v170_v42, 2  ;;  %v184_v60 = vadd.f32 %v183_v15, %v182_v40 }
  0xc3   :  { %v151_v58 = vadd.f32 %v150_v41, %v149_v37  ;;  %v178_v17 = vrot.slane %v177_v48, 2  ;;  %v158_v18 = vadd.f32 %v157_v34, %v156_v32  ;;  %v950_v19 = vadd.f32 %v164_v57, %v163_v39 }
  0xc4   :  { %v191_v20 = vadd.f32 %v190_v49, %v189_v47  ;;  %v145_v21 = vrot.slane %v144_v7, 1  ;;  %v952_v22 = vadd.f32 %v171_v8, %v170_v42  ;;  %v185_v63 = vrot.slane %v184_v60, 2 }
  0xc5   :  { %v152_v61 = vrot.slane %v151_v58, 1  ;;  %v159_v51 = vrot.slane %v158_v18, 1  ;;  %v954_v62 = vadd.f32 %v178_v17, %v177_v48  ;;  %v166_v28 = vrot.slane %v950_v19, 1 }
  0xc6   :  { %v146_v0 = vadd.f32 %v145_v21, %v144_v7  ;;  %v957_v29 = vadd.f32 %v185_v63, %v184_v60  ;;  %v192_v5 = vrot.slane %v191_v20, 2  ;;  %v173_v10 = vrot.slane %v952_v22, 1 }
  0xc7   :  { %v153_v16 = vadd.f32 %v152_v61, %v151_v58  ;;  %v196_v50 = vsel %vm139_vm1, %v131_v14, 0.0  ;;  %v203_v11 = vsel %vm139_vm1, %v132_v52, 0.0  ;;  %v160_v30 = vadd.f32 %v159_v51, %v158_v18 }
  0xc8   :  { %v180_v12 = vrot.slane %v954_v62, 1  ;;  %v197_v53 = vrot.slane %v196_v50, 4  ;;  %v204_v13 = vrot.slane %v203_v11, 4  ;;  %v210_v46 = vsel %vm139_vm1, %v133_v43, 0.0 }
  0xc9   :  { %v217_v1 = vsel %vm139_vm1, %v134_v54, 0.0  ;;  %v224_v2 = vsel %vm139_vm1, %v135_v44, 0.0  ;;  %v231_v3 = vsel %vm139_vm1, %v136_v55, 0.0  ;;  %v187_v4 = vrot.slane %v957_v29, 1 }
  0xca   :  { %v193_v35 = vadd.f32 %v192_v5, %v191_v20  ;;  %v198_v23 = vadd.f32 %v197_v53, %v196_v50  ;;  %v205_v14 = vadd.f32 %v204_v13, %v203_v11  ;;  %v211_v24 = vrot.slane %v210_v46, 4 }
  0xcb   :  { %v218_v52 = vrot.slane %v217_v1, 4  ;;  %v225_v36 = vrot.slane %v224_v2, 4  ;;  %v232_v25 = vrot.slane %v231_v3, 4  ;;  %v238_v43 = vsel %vm139_vm1, %v137_v45, 0.0 }
  0xcc   :  { %v199_v31 = vrot.slane %v198_v23, 2  ;;  %v206_v37 = vrot.slane %v205_v14, 2  ;;  %v245_v54 = vsel %vm139_vm1, %v138_v56, 0.0  ;;  %v212_v44 = vadd.f32 %v211_v24, %v210_v46 }
  0xcd   :  { %v219_v55 = vadd.f32 %v218_v52, %v217_v1  ;;  %v226_v38 = vadd.f32 %v225_v36, %v224_v2  ;;  %v233_v26 = vadd.f32 %v232_v25, %v231_v3  ;;  %v239_v40 = vrot.slane %v238_v43, 4 }
  0xce   :  { %v200_v32 = vadd.f32 %v199_v31, %v198_v23  ;;  %v207_v39 = vadd.f32 %v206_v37, %v205_v14  ;;  %v246_v47 = vrot.slane %v245_v54, 4  ;;  %v213_v33 = vrot.slane %v212_v44, 2 }
  0xcf   :  { %v220_v41 = vrot.slane %v219_v55, 2  ;;  %v227_v42 = vrot.slane %v226_v38, 2  ;;  %v234_v48 = vrot.slane %v233_v26, 2  ;;  %v240_v45 = vadd.f32 %v239_v40, %v238_v43 }
  0xd0   :  { %v201_v27 = vrot.slane %v200_v32, 1  ;;  %v208_v6 = vrot.slane %v207_v39, 1  ;;  %v247_v34 = vadd.f32 %v246_v47, %v245_v54  ;;  %v214_v57 = vadd.f32 %v213_v33, %v212_v44 }
  0xd1   :  { %v221_v59 = vadd.f32 %v220_v41, %v219_v55  ;;  %v228_v9 = vadd.f32 %v227_v42, %v226_v38  ;;  %v235_v56 = vadd.f32 %v234_v48, %v233_v26  ;;  %v241_v7 = vrot.slane %v240_v45, 2 }
  0xd2   :  { %v202_v15 = vadd.f32 %v201_v27, %v200_v32  ;;  %v209_v49 = vadd.f32 %v208_v6, %v207_v39  ;;  %v248_v58 = vrot.slane %v247_v34, 2  ;;  %v215_v8 = vrot.slane %v214_v57, 1 }
  0xd3   :  { %v222_v17 = vrot.slane %v221_v59, 1  ;;  %v229_v18 = vrot.slane %v228_v9, 1  ;;  %v236_v60 = vrot.slane %v235_v56, 1  ;;  %v242_v20 = vadd.f32 %v241_v7, %v240_v45 }
  0xd4   :  { %v249_v21 = vadd.f32 %v248_v58, %v247_v34  ;;  %v429_v61 = vsel %vm428_vm2, %v153_v16, %v146_v0  ;;  %v442_v51 = vsel %vm428_vm2, %v209_v49, %v202_v15  ;;  %v167_v63 = vadd.f32 %v166_v28, %v950_v19 }
  0xd5   :  { %v174_v5 = vadd.f32 %v173_v10, %v952_v22  ;;  %v194_v50 = vrot.slane %v193_v35, 1  ;;  %v216_v11 = vadd.f32 %v215_v8, %v214_v57  ;;  %v223_v53 = vadd.f32 %v222_v17, %v221_v59 }
  0xd6   :  { %v243_v13 = vrot.slane %v242_v20, 1  ;;  %v250_v46 = vrot.slane %v249_v21, 1  ;;  %v431_v1 = vsel %vm430_vm3, %v160_v30, %v429_v61  ;;  %v181_v2 = vadd.f32 %v180_v12, %v954_v62 }
  0xd7   :  { %v230_v3 = vadd.f32 %v229_v18, %v228_v9  ;;  %v433_v23 = vsel %vm432_vm4, %v167_v63, %v431_v1  ;;  %v443_v0 = vsel %vm430_vm3, %v216_v11, %v442_v51  ;;  %v188_v16 = vadd.f32 %v187_v4, %v957_v29 }
  0xd8   :  { %v237_v14 = vadd.f32 %v236_v60, %v235_v56  ;;  %v435_v19 = vsel %vm434_vm5, %v174_v5, %v433_v23  ;;  %v444_v22 = vsel %vm432_vm4, %v223_v53, %v443_v0  ;;  %v195_v28 = vadd.f32 %v194_v50, %v193_v35  ;;  %v490_v35 = vld [vmem:[%s1012_s3] sm:$0xf] }
  0xd9   :  { %v244_v10 = vadd.f32 %v243_v13, %v242_v20  ;;  %v437_v24 = vsel %vm436_vm6, %v181_v2, %v435_v19  ;;  %v445_v30 = vsel %vm434_vm5, %v230_v3, %v444_v22  ;;  %v251_v52 = vadd.f32 %v250_v46, %v249_v21 }
  0xda   :  { %v439_v62 = vsel %vm438_vm7, %v188_v16, %v437_v24  ;;  %v446_v12 = vsel %vm436_vm6, %v237_v14, %v445_v30  ;;  %v497_v25 = vsel %vm495_vm9, %v490_v35, 0 }
  0xdb   :  { %v441_v36 = vsel %vm440_vm8, %v195_v28, %v439_v62  ;;  %v447_v29 = vsel %vm438_vm7, %v244_v10, %v446_v12  ;;  %506 = vmatpush.bf16.msra.mxu2 %v497_v25 }
  0xdc   :  { %v448_v4 = vsel %vm440_vm8, %v251_v52, %v447_v29 }
 0x127   :  { %v535_v31 = vpop.permute.xlu0 %534 }
 0x128   :  { %v537_v37 = vunpack.i.h.bf16 %v535_v31  ;;  %v536_v43 = vunpack.i.l.bf16 %v535_v31 }
 0x12a   :  { %v487_v54 = vsel %vm139_vm1, %v441_v36, %v536_v43  ;;  %v488_v44 = vsel %vm139_vm1, %v448_v4, %v537_v37 }
 0x12b   :  { %v489_v55 = vpack.c.bf16 %v488_v44, %v487_v54 }
 0x12d   :  { %529 = vmatmul.msk.bf16.vlgmr.msra.gmra.mxu2 %vm491_vm10, %v489_v55 }
 0x1b0   :  { %v508_v38 = vpop.f32.mrf.mxu2 }
 0x1b1   :  { %513 = vst.msk [vmem:[%s1013_s6] sm:$0xff] %vm35_vm0, %v508_v38 }
 0x1b8   :  { %v510_v26 = vpop.f32.mrf.mxu2 }
 0x1b9   :  { %514 = vst.msk [vmem:[%s1013_s6 + $0x8] sm:$0xff] %vm35_vm0, %v510_v26 }

</bundles_post_ra>
